<compile_context>
chip_gen: v7x
topology: tpu7x:2x2x1
jax: 0.10.0
libtpu: 0.0.40
codegen_flags: <defaults>
</compile_context>

<pallas_src>
import jax
import jax.numpy as jnp
import numpy as np
from jax.experimental import pallas as pl
from jax.experimental.pallas import tpu as pltpu


def _vmem_limit(nbytes):
    # double-buffered working set + slack, clamped to [16 MiB, 64 MiB]
    # (64 MiB == v7x physical VMEM per TensorCore)
    return int(min(max(2 * nbytes + (4 << 20), 16 << 20), 64 << 20))


# --------------------------- kernel 1: recurrence ----------------------------
def gru_recurrence_kernel(ft_ref, enc_w_ref, enc_b_ref, x_ref, wih_ref, whh_ref,
                          b_i_ref, b_hn_ref, hhist_ref, gi_ref):
    B = ft_ref.shape[0]
    H = enc_w_ref.shape[1]
    Tm1 = x_ref.shape[0] // B

    # fused PCA encoder -> initial GRU hidden state (kept f32)
    h0 = (jnp.dot(ft_ref[...], enc_w_ref[...], preferred_element_type=jnp.float32)
          + enc_b_ref[...])                                               # [B, H]

    # hoisted input-gate matmul, batched over all timesteps, single [., 3H] dot
    # (r/z hidden biases already folded into b_i by the wrapper)
    gi_ref[...] = (jnp.dot(x_ref[...], wih_ref[...],
                           preferred_element_type=jnp.float32) + b_i_ref[...])

    whh = whh_ref[...]                                                    # [H, 3H]
    b_hn = jnp.broadcast_to(b_hn_ref[...], (B, H))                        # hoisted broadcast

    def step(t, h):
        rows = pl.ds(pl.multiple_of(t * B, B), B)
        gi_t = gi_ref[rows, :]                                            # [B, 3H]
        # single fused hidden-gate matmul per step (1 MXU dispatch, 3H lanes)
        gh = jnp.dot(h.astype(whh.dtype), whh,
                     preferred_element_type=jnp.float32)                  # [B, 3H]
        r = jax.nn.sigmoid(gi_t[:, :H] + gh[:, :H])
        z = jax.nn.sigmoid(gi_t[:, H:2 * H] + gh[:, H:2 * H])
        n = jnp.tanh(gi_t[:, 2 * H:] + r * (gh[:, 2 * H:] + b_hn))
        h_new = (1.0 - z) * n + z * h                                     # [B, H]
        hhist_ref[rows, :] = h_new.astype(hhist_ref.dtype)
        return h_new

    jax.lax.fori_loop(0, Tm1, step, h0)


def gru_recurrence(ft, enc_w, enc_b, x_flat, wih, whh, b_i, b_hn, *, out_dtype):
    R = x_flat.shape[0]
    H = enc_w.shape[1]
    args = (ft, enc_w, enc_b, x_flat, wih, whh, b_i, b_hn)

    def full_spec(a):
        return pl.BlockSpec(a.shape, lambda i: (0,) * a.ndim)

    in_bytes = sum(int(np.prod(a.shape)) * jnp.dtype(a.dtype).itemsize for a in args)
    out_bytes = R * H * jnp.dtype(out_dtype).itemsize
    scratch_bytes = R * 3 * H * 4

    return pl.pallas_call(
        gru_recurrence_kernel,
        out_shape=jax.ShapeDtypeStruct((R, H), out_dtype),
        grid=(1,),
        in_specs=[full_spec(a) for a in args],
        out_specs=pl.BlockSpec((R, H), lambda i: (0, 0)),
        scratch_shapes=[pltpu.VMEM((R, 3 * H), jnp.float32)],
        compiler_params=pltpu.CompilerParams(
            dimension_semantics=("arbitrary",),
            vmem_limit_bytes=_vmem_limit(in_bytes + out_bytes + scratch_bytes)),
    )(*args)


# -------------------- kernel 2: batched vocab projection + NLL ---------------
def vocab_loss_kernel(h_ref, wout_ref, bout_ref, tgt_ref, nll_ref,
                      m_sc, l_sc, t_sc):
    j = pl.program_id(1)
    TV = wout_ref.shape[1]

    @pl.when(j == 0)
    def _():
        m_sc[...] = jnp.full_like(m_sc, -jnp.inf)
        l_sc[...] = jnp.zeros_like(l_sc)
        t_sc[...] = jnp.zeros_like(t_sc)

    # batched-over-time vocab projection for this V tile
    logits = (jnp.dot(h_ref[...], wout_ref[...],
                      preferred_element_type=jnp.float32) + bout_ref[...])  # [TR, TV]

    # online logsumexp across V tiles
    m_new = jnp.maximum(m_sc[...], jnp.max(logits, axis=-1, keepdims=True))
    l_sc[...] = (l_sc[...] * jnp.exp(m_sc[...] - m_new)
                 + jnp.sum(jnp.exp(logits - m_new), axis=-1, keepdims=True))
    m_sc[...] = m_new

    # target-logit select (tgt == -1 marks masked rows -> contributes 0)
    tgt = tgt_ref[...]                                                    # [TR, 1]
    lane = jax.lax.broadcasted_iota(jnp.int32, logits.shape, 1) + j * TV
    t_sc[...] += jnp.sum(jnp.where(lane == tgt, logits, 0.0),
                         axis=-1, keepdims=True)

    @pl.when(j == pl.num_programs(1) - 1)
    def _():
        lse = m_sc[...] + jnp.log(l_sc[...])
        mask = (tgt_ref[...] >= 0).astype(jnp.float32)
        nll_ref[...] = (lse - t_sc[...]) * mask                           # [TR, 1]


def vocab_projection_nll(h_hist, wout, bout, tgt_masked, *, tile_r=256, tile_v=512):
    R, H = h_hist.shape
    V = wout.shape[1]
    tr = tile_r if (0 < tile_r <= R and R % tile_r == 0 and tile_r % 8 == 0) else R
    tv = tile_v if (0 < tile_v <= V and V % tile_v == 0 and tile_v % 128 == 0) else V
    nr, nv = R // tr, V // tv

    blk_bytes = (tr * H * h_hist.dtype.itemsize + H * tv * wout.dtype.itemsize
                 + tv * 4 + tr * 4 + tr * 4 + 3 * tr * 4)

    return pl.pallas_call(
        vocab_loss_kernel,
        out_shape=jax.ShapeDtypeStruct((R, 1), jnp.float32),
        grid=(nr, nv),
        in_specs=[
            pl.BlockSpec((tr, H), lambda r, j: (r, 0)),     # h-history row tile
            pl.BlockSpec((H, tv), lambda r, j: (0, j)),     # streamed wout V tile
            pl.BlockSpec((1, tv), lambda r, j: (0, j)),     # bout V tile
            pl.BlockSpec((tr, 1), lambda r, j: (r, 0)),     # masked target ids
        ],
        out_specs=pl.BlockSpec((tr, 1), lambda r, j: (r, 0)),
        scratch_shapes=[pltpu.VMEM((tr, 1), jnp.float32)] * 3,
        compiler_params=pltpu.CompilerParams(
            dimension_semantics=("parallel", "arbitrary"),
            vmem_limit_bytes=_vmem_limit(blk_bytes)),
    )(h_hist, wout, bout, tgt_masked)


# ------------------------------- full model ----------------------------------
def model_forward_trn(params, ft, captionids, caption_lens, *,
                      matmul_dtype=jnp.float32, tile_r=256, tile_v=512):
    """Equivalent of Model.forward('trn', ft, captionids=..., caption_lens=...)."""
    B, T = captionids.shape
    H = params["enc_w"].shape[1]
    E = params["word_emb"].shape[1]
    Tm1 = T - 1
    md = jnp.dtype(matmul_dtype)

    # glue (layout plumbing only): embedding lookup, time-major flatten,
    # mask folded into target ids, gate-bias folding, MXU-operand dtype casts
    inp_ids = captionids[:, :-1]                                          # [B, T-1]
    tgt_ids = captionids[:, 1:]                                           # [B, T-1]
    x_emb = jnp.take(params["word_emb"], inp_ids, axis=0)                 # [B, T-1, E]
    x_flat = jnp.transpose(x_emb, (1, 0, 2)).reshape(Tm1 * B, E).astype(md)

    steps = jnp.arange(1, T)[None, :]                                     # [1, T-1]
    mask = steps < caption_lens[:, None]                                  # [B, T-1] bool
    mask_sum = jnp.sum(mask.astype(jnp.float32))
    tgt_masked = jnp.where(jnp.transpose(mask, (1, 0)),
                           jnp.transpose(tgt_ids, (1, 0)), -1)            # -1 == padded
    tgt_masked = tgt_masked.astype(jnp.int32).reshape(Tm1 * B, 1)

    wih, whh = params["gru_wih"], params["gru_whh"]
    bih, bhh = params["gru_bih"], params["gru_bhh"]
    # fold r/z hidden biases into the input bias; keep b_hn separate (n gate)
    b_i = jnp.concatenate([bih[:, :2 * H] + bhh[:, :2 * H], bih[:, 2 * H:]], axis=1)
    b_hn = bhh[:, 2 * H:]

    h_hist = gru_recurrence(
        ft.astype(jnp.float32), params["enc_w"], params["enc_b"],
        x_flat, wih.astype(md), whh.astype(md), b_i, b_hn, out_dtype=md)

    nll = vocab_projection_nll(
        h_hist, params["out_w"].astype(md), params["out_b"], tgt_masked,
        tile_r=tile_r, tile_v=tile_v)                                     # [(T-1)*B, 1]

    # guard only matters for the degenerate all-empty-caption case (ref -> NaN)
    return jnp.sum(nll) / jnp.maximum(mask_sum, 1.0)


# --------------------------- pure-JAX reference ------------------------------
def reference_forward(params, ft, captionids, caption_lens):
    B, T = captionids.shape
    H = params["enc_w"].shape[1]
    h = ft @ params["enc_w"] + params["enc_b"]
    inp_ids = captionids[:, :-1]
    tgt_ids = captionids[:, 1:]
    steps = jnp.arange(1, T)[None, :]
    mask = (steps < caption_lens[:, None]).astype(jnp.float32)
    loss_sum = 0.0
    mask_sum = jnp.sum(mask)
    for t in range(T - 1):
        x = params["word_emb"][inp_ids[:, t]]
        gi = x @ params["gru_wih"] + params["gru_bih"]
        gh = h @ params["gru_whh"] + params["gru_bhh"]
        r = jax.nn.sigmoid(gi[:, :H] + gh[:, :H])
        z = jax.nn.sigmoid(gi[:, H:2 * H] + gh[:, H:2 * H])
        n = jnp.tanh(gi[:, 2 * H:] + r * gh[:, 2 * H:])
        h = (1.0 - z) * n + z * h
        logits = h @ params["out_w"] + params["out_b"]
        logp = jax.nn.log_softmax(logits, axis=-1)
        tgt_logp = jnp.take_along_axis(logp, tgt_ids[:, t:t + 1], axis=-1)[:, 0]
        loss_sum = loss_sum + jnp.sum(-tgt_logp * mask[:, t])
    return loss_sum / mask_sum


# ---------------------------------- main -------------------------------------
if __name__ == "__main__":
    # small config (V > 128 so the V-tiled online-logsumexp path is exercised)
    B, D_ft, E, H, V, T = 8, 32, 16, 32, 256, 8

    key = jax.random.PRNGKey(0)
    ks = jax.random.split(key, 12)
    params = {
        "enc_w": 0.1 * jax.random.normal(ks[0], (D_ft, H), jnp.float32),
        "enc_b": 0.1 * jax.random.normal(ks[1], (1, H), jnp.float32),
        "word_emb": 0.1 * jax.random.normal(ks[2], (V, E), jnp.float32),
        "gru_wih": 0.1 * jax.random.normal(ks[3], (E, 3 * H), jnp.float32),
        "gru_whh": 0.1 * jax.random.normal(ks[4], (H, 3 * H), jnp.float32),
        "gru_bih": 0.1 * jax.random.normal(ks[5], (1, 3 * H), jnp.float32),
        "gru_bhh": 0.1 * jax.random.normal(ks[6], (1, 3 * H), jnp.float32),
        "out_w": 0.1 * jax.random.normal(ks[7], (H, V), jnp.float32),
        "out_b": 0.1 * jax.random.normal(ks[8], (1, V), jnp.float32),
    }

    ft = jax.random.normal(ks[9], (B, D_ft), jnp.float32)
    captionids = jax.random.randint(ks[10], (B, T), 0, V, dtype=jnp.int32)
    caption_lens = jax.random.randint(ks[11], (B,), 2, T + 1, dtype=jnp.int32)

    ref = jax.block_until_ready(
        reference_forward(params, ft, captionids, caption_lens))

    # f32 matmuls (exactness check); small tiles to exercise the (row, V) grid
    loss_f32 = jax.block_until_ready(
        model_forward_trn(params, ft, captionids, caption_lens,
                          matmul_dtype=jnp.float32, tile_r=8, tile_v=128))
    np.testing.assert_allclose(np.asarray(loss_f32), np.asarray(ref),
                               rtol=1e-4, atol=1e-4)

    # bf16 MXU operands (f32 accumulate / elementwise) — the config used at
    # realistic H/V sizes so wout fits v7x VMEM and the MXU runs bf16-native
    loss_bf16 = jax.block_until_ready(
        model_forward_trn(params, ft, captionids, caption_lens,
                          matmul_dtype=jnp.bfloat16, tile_r=8, tile_v=128))
    np.testing.assert_allclose(np.asarray(loss_bf16), np.asarray(ref),
                               rtol=5e-2, atol=5e-2)

    # TODO(synk): mode='val'/'tst' decode strategies (beam/sample/top-k/nucleus)
    #             of the original Model are not implemented here.
    print("KERNEL_OK")
</pallas_src>

<mosaic_0001>
module attributes {stable_mosaic.version = 11 : i64} {
  func.func @gru_recurrence_kernel(%arg0: i32, %arg1: memref<8x32xf32, #tpu.memory_space<vmem>>, %arg2: memref<32x32xf32, #tpu.memory_space<vmem>>, %arg3: memref<1x32xf32, #tpu.memory_space<vmem>>, %arg4: memref<56x16xf32, #tpu.memory_space<vmem>>, %arg5: memref<16x96xf32, #tpu.memory_space<vmem>>, %arg6: memref<32x96xf32, #tpu.memory_space<vmem>>, %arg7: memref<1x96xf32, #tpu.memory_space<vmem>>, %arg8: memref<1x32xf32, #tpu.memory_space<vmem>>, %arg9: memref<56x32xf32, #tpu.memory_space<vmem>>, %arg10: memref<56x96xf32, #tpu.memory_space<vmem>>) attributes {dimension_semantics = [#tpu.dimension_semantics<arbitrary>], iteration_bounds = array<i64: 1>, scalar_prefetch = 0 : i64, scratch_operands = 1 : i64, tpu.core_type = #tpu.core_type<tc>, window_params = [{pipeline_mode = #tpu.pipeline_mode<synchronous>, transform_indices = @transform_0, window_bounds = array<i64: 8, 32>}, {pipeline_mode = #tpu.pipeline_mode<synchronous>, transform_indices = @transform_1, window_bounds = array<i64: 32, 32>}, {pipeline_mode = #tpu.pipeline_mode<synchronous>, transform_indices = @transform_2, window_bounds = array<i64: 1, 32>}, {pipeline_mode = #tpu.pipeline_mode<synchronous>, transform_indices = @transform_3, window_bounds = array<i64: 56, 16>}, {pipeline_mode = #tpu.pipeline_mode<synchronous>, transform_indices = @transform_4, window_bounds = array<i64: 16, 96>}, {pipeline_mode = #tpu.pipeline_mode<synchronous>, transform_indices = @transform_5, window_bounds = array<i64: 32, 96>}, {pipeline_mode = #tpu.pipeline_mode<synchronous>, transform_indices = @transform_6, window_bounds = array<i64: 1, 96>}, {pipeline_mode = #tpu.pipeline_mode<synchronous>, transform_indices = @transform_7, window_bounds = array<i64: 1, 32>}, {pipeline_mode = #tpu.pipeline_mode<synchronous>, transform_indices = @transform_8, window_bounds = array<i64: 56, 32>}]} {
    %c0 = arith.constant 0 : index
    %c0_0 = arith.constant 0 : index
    %0 = vector.load %arg1[%c0, %c0_0] : memref<8x32xf32, #tpu.memory_space<vmem>>, vector<8x32xf32>
    %c0_1 = arith.constant 0 : index
    %c0_2 = arith.constant 0 : index
    %1 = vector.load %arg2[%c0_1, %c0_2] : memref<32x32xf32, #tpu.memory_space<vmem>>, vector<32x32xf32>
    %cst = arith.constant dense<0.000000e+00> : vector<8x32xf32>
    %2 = tpu.matmul %0, %1, %cst {dimension_numbers = #tpu.dot_dimension_numbers<[1], [0], [0], [1], [0, 0, 1, 1], [], []>} : vector<8x32xf32>, vector<32x32xf32>, vector<8x32xf32> -> vector<8x32xf32>
    %c0_3 = arith.constant 0 : index
    %c0_4 = arith.constant 0 : index
    %3 = vector.load %arg3[%c0_3, %c0_4] : memref<1x32xf32, #tpu.memory_space<vmem>>, vector<1x32xf32>
    %4 = vector.broadcast %3 : vector<1x32xf32> to vector<8x32xf32>
    %5 = arith.addf %2, %4 : vector<8x32xf32>
    %c0_5 = arith.constant 0 : index
    %c0_6 = arith.constant 0 : index
    %6 = vector.load %arg4[%c0_5, %c0_6] : memref<56x16xf32, #tpu.memory_space<vmem>>, vector<56x16xf32>
    %c0_7 = arith.constant 0 : index
    %c0_8 = arith.constant 0 : index
    %7 = vector.load %arg5[%c0_7, %c0_8] : memref<16x96xf32, #tpu.memory_space<vmem>>, vector<16x96xf32>
    %cst_9 = arith.constant dense<0.000000e+00> : vector<56x96xf32>
    %8 = tpu.matmul %6, %7, %cst_9 {dimension_numbers = #tpu.dot_dimension_numbers<[1], [0], [0], [1], [0, 0, 1, 1], [], []>} : vector<56x16xf32>, vector<16x96xf32>, vector<56x96xf32> -> vector<56x96xf32>
    %c0_10 = arith.constant 0 : index
    %c0_11 = arith.constant 0 : index
    %9 = vector.load %arg7[%c0_10, %c0_11] : memref<1x96xf32, #tpu.memory_space<vmem>>, vector<1x96xf32>
    %10 = vector.broadcast %9 : vector<1x96xf32> to vector<56x96xf32>
    %11 = arith.addf %8, %10 : vector<56x96xf32>
    %c0_12 = arith.constant 0 : index
    %c0_13 = arith.constant 0 : index
    %12 = vector.load %arg10[%c0_12, %c0_13] : memref<56x96xf32, #tpu.memory_space<vmem>>, vector<56x96xf32>
    tpu.vector_store %arg10[%c0_12, %c0_13], %11 {strides = array<i32>} : memref<56x96xf32, #tpu.memory_space<vmem>>, vector<56x96xf32>,
    %c0_14 = arith.constant 0 : index
    %c0_15 = arith.constant 0 : index
    %13 = vector.load %arg6[%c0_14, %c0_15] : memref<32x96xf32, #tpu.memory_space<vmem>>, vector<32x96xf32>
    %c0_16 = arith.constant 0 : index
    %c0_17 = arith.constant 0 : index
    %14 = vector.load %arg8[%c0_16, %c0_17] : memref<1x32xf32, #tpu.memory_space<vmem>>, vector<1x32xf32>
    %15 = vector.shape_cast %14 : vector<1x32xf32> to vector<1x32xf32>
    %16 = vector.broadcast %15 : vector<1x32xf32> to vector<8x32xf32>
    %c0_i32 = arith.constant 0 : i32
    %c7_i32 = arith.constant 7 : i32
    %17 = arith.addi %c0_i32, %c7_i32 : i32
    %c1_i32 = arith.constant 1 : i32
    %18 = scf.for %arg11 = %c0_i32 to %17 step %c1_i32 iter_args(%arg12 = %5) -> (vector<8x32xf32>)  : i32 {
      %c8_i32 = arith.constant 8 : i32
      %19 = arith.muli %arg11, %c8_i32 : i32
      %20 = tpu.assume_multiple %19, 8 : i32
      %21 = arith.index_cast %20 : i32 to index
      %c0_19 = arith.constant 0 : index
      %22 = vector.load %arg10[%21, %c0_19] : memref<56x96xf32, #tpu.memory_space<vmem>>, vector<8x96xf32>
      %cst_20 = arith.constant dense<0.000000e+00> : vector<8x96xf32>
      %23 = tpu.matmul %arg12, %13, %cst_20 {dimension_numbers = #tpu.dot_dimension_numbers<[1], [0], [0], [1], [0, 0, 1, 1], [], []>} : vector<8x32xf32>, vector<32x96xf32>, vector<8x96xf32> -> vector<8x96xf32>
      %24 = vector.extract_strided_slice %22 {offsets = [0, 0], sizes = [8, 32], strides = [1, 1]} : vector<8x96xf32> to vector<8x32xf32>
      %25 = vector.extract_strided_slice %23 {offsets = [0, 0], sizes = [8, 32], strides = [1, 1]} : vector<8x96xf32> to vector<8x32xf32>
      %26 = arith.addf %24, %25 : vector<8x32xf32>
      %27 = arith.negf %26 : vector<8x32xf32>
      %28 = math.exp %27 : vector<8x32xf32>
      %cst_21 = arith.constant 1.000000e+00 : f32
      %29 = vector.broadcast %cst_21 : f32 to vector<8x32xf32>
      %30 = arith.addf %29, %28 : vector<8x32xf32>
      %31 = arith.divf %29, %30 : vector<8x32xf32>
      %32 = vector.extract_strided_slice %22 {offsets = [0, 32], sizes = [8, 32], strides = [1, 1]} : vector<8x96xf32> to vector<8x32xf32>
      %33 = vector.extract_strided_slice %23 {offsets = [0, 32], sizes = [8, 32], strides = [1, 1]} : vector<8x96xf32> to vector<8x32xf32>
      %34 = arith.addf %32, %33 : vector<8x32xf32>
      %35 = arith.negf %34 : vector<8x32xf32>
      %36 = math.exp %35 : vector<8x32xf32>
      %cst_22 = arith.constant 1.000000e+00 : f32
      %37 = vector.broadcast %cst_22 : f32 to vector<8x32xf32>
      %38 = arith.addf %37, %36 : vector<8x32xf32>
      %39 = arith.divf %37, %38 : vector<8x32xf32>
      %40 = vector.extract_strided_slice %22 {offsets = [0, 64], sizes = [8, 32], strides = [1, 1]} : vector<8x96xf32> to vector<8x32xf32>
      %41 = vector.extract_strided_slice %23 {offsets = [0, 64], sizes = [8, 32], strides = [1, 1]} : vector<8x96xf32> to vector<8x32xf32>
      %42 = arith.addf %41, %16 : vector<8x32xf32>
      %43 = arith.mulf %31, %42 : vector<8x32xf32>
      %44 = arith.addf %40, %43 : vector<8x32xf32>
      %45 = math.tanh %44 : vector<8x32xf32>
      %cst_23 = arith.constant 1.000000e+00 : f32
      %46 = vector.broadcast %cst_23 : f32 to vector<8x32xf32>
      %47 = arith.subf %46, %39 : vector<8x32xf32>
      %48 = arith.mulf %47, %45 : vector<8x32xf32>
      %49 = arith.mulf %39, %arg12 : vector<8x32xf32>
      %50 = arith.addf %48, %49 : vector<8x32xf32>
      %51 = arith.index_cast %20 : i32 to index
      %c0_24 = arith.constant 0 : index
      %52 = vector.load %arg9[%51, %c0_24] : memref<56x32xf32, #tpu.memory_space<vmem>>, vector<8x32xf32>
      tpu.vector_store %arg9[%51, %c0_24], %50 {strides = array<i32>} : memref<56x32xf32, #tpu.memory_space<vmem>>, vector<8x32xf32>,
      scf.yield %50 : vector<8x32xf32>
    }
    %c7_i32_18 = arith.constant 7 : i32
    return
  }
  func.func @transform_0(%arg0: i32) -> (i32, i32) {
    %c0_i32 = arith.constant 0 : i32
    %c0_i32_0 = arith.constant 0 : i32
    %c0_i32_1 = arith.constant 0 : i32
    return %c0_i32, %c0_i32_0 : i32, i32
  }
  func.func @transform_1(%arg0: i32) -> (i32, i32) {
    %c0_i32 = arith.constant 0 : i32
    %c0_i32_0 = arith.constant 0 : i32
    %c0_i32_1 = arith.constant 0 : i32
    return %c0_i32, %c0_i32_0 : i32, i32
  }
  func.func @transform_2(%arg0: i32) -> (i32, i32) {
    %c0_i32 = arith.constant 0 : i32
    %c0_i32_0 = arith.constant 0 : i32
    %c0_i32_1 = arith.constant 0 : i32
    return %c0_i32, %c0_i32_0 : i32, i32
  }
  func.func @transform_3(%arg0: i32) -> (i32, i32) {
    %c0_i32 = arith.constant 0 : i32
    %c0_i32_0 = arith.constant 0 : i32
    %c0_i32_1 = arith.constant 0 : i32
    return %c0_i32, %c0_i32_0 : i32, i32
  }
  func.func @transform_4(%arg0: i32) -> (i32, i32) {
    %c0_i32 = arith.constant 0 : i32
    %c0_i32_0 = arith.constant 0 : i32
    %c0_i32_1 = arith.constant 0 : i32
    return %c0_i32, %c0_i32_0 : i32, i32
  }
  func.func @transform_5(%arg0: i32) -> (i32, i32) {
    %c0_i32 = arith.constant 0 : i32
    %c0_i32_0 = arith.constant 0 : i32
    %c0_i32_1 = arith.constant 0 : i32
    return %c0_i32, %c0_i32_0 : i32, i32
  }
  func.func @transform_6(%arg0: i32) -> (i32, i32) {
    %c0_i32 = arith.constant 0 : i32
    %c0_i32_0 = arith.constant 0 : i32
    %c0_i32_1 = arith.constant 0 : i32
    return %c0_i32, %c0_i32_0 : i32, i32
  }
  func.func @transform_7(%arg0: i32) -> (i32, i32) {
    %c0_i32 = arith.constant 0 : i32
    %c0_i32_0 = arith.constant 0 : i32
    %c0_i32_1 = arith.constant 0 : i32
    return %c0_i32, %c0_i32_0 : i32, i32
  }
  func.func @transform_8(%arg0: i32) -> (i32, i32) {
    %c0_i32 = arith.constant 0 : i32
    %c0_i32_0 = arith.constant 0 : i32
    %c0_i32_1 = arith.constant 0 : i32
    return %c0_i32, %c0_i32_0 : i32, i32
  }
}

</mosaic_0001>

<bundles_post_ra>
// kernel: tpu_custom_call.1
= control target key start
LH: loop header
LB: loop body
LE: loop exit
PB: predicated region body
PF: predicated region fallthrough
CT: control target
= control target key end

     0   :  { %13 = vsyncpa [#allocation4], 0  ;;  %s591_s27 = smov [#allocation3]   ;;  %s770_s0 = inlined_call_operand.hbm [shape: f32[8,32], index: 0, kind: input, shape index: {}]   ;;  %s771_s1 = inlined_call_operand.vmem [shape: f32[32,32], index: 1, kind: input, shape index: {}]   ;;  %s772_s2 = inlined_call_operand.vmem [shape: f32[1,32], index: 2, kind: input, shape index: {}]   ;;  %s773_s3 = inlined_call_operand.vmem [shape: f32[56,16], index: 3, kind: input, shape index: {}]   ;;  %s774_s4 = inlined_call_operand.vmem [shape: f32[16,96], index: 4, kind: input, shape index: {}]   ;;  %s775_s5 = inlined_call_operand.vmem [shape: f32[32,96], index: 5, kind: input, shape index: {}]   ;;  %s776_s6 = inlined_call_operand.vmem [shape: f32[1,96], index: 6, kind: input, shape index: {}]   ;;  %s777_s7 = inlined_call_operand.vmem [shape: f32[1,32], index: 7, kind: input, shape index: {}]   ;;  %s778_s8 = inlined_call_operand.vmem [shape: f32[56,32], index: 8, kind: output, shape index: {}]  }
   0x1   :  { %s20_s28 = sshll.u32 %s591_s27, 4  ;;  %s551_s9 = scalar_lea.hbm %s770_s0, 128  ;;  %s21_s28 = int_to_ptr.vmem [resolvable:$true] %s20_s28 }
   0x2   :  { %p552_p0 = scmp.ne.s32.totalorder %s770_s0, %s551_s9  ;;  %p555_p1 = scmp.lt.u32.totalorder %s551_s9, %s770_s0 }
   0x4   :  { %p557_p2 = pnand %p555_p1, %p552_p0 }
   0x6   :  { %560 = shalt.err (!%p557_p2)
}
   0x7   :  { %s561_s14 = scalar_lea.vmem %s21_s28, 128  ;;  %p566_p4 = scmp.lt.s32.totalorder %s21_s28, %s21_s28 }
   0x8   :  { %p562_p3 = scmp.ne.s32.totalorder %s21_s28, %s561_s14  ;;  %p567_p5 = scmp.lt.s32.totalorder %s561_s14, %s561_s14 }
   0xa   :  { %p568_p6 = por %p567_p5, %p566_p4 }
   0xc   :  { %p569_p7 = pnand %p568_p6, %p562_p3 }
   0xe   :  { %572 = shalt.err (!%p569_p7)
}
   0xf   :  { %23 = dma.hbm_to_vmem [thread:$0]  %s770_s0, 128, %s21_s28, [#allocation4]  }
  0x10   :  { %581 = dma.done.wait [#allocation4], 128  }
  0x11   :  { %582 = vsyncadd [#allocation4], 4294967168  ;;  %v592_v0 = vmov 0.0|0.0   ;;  %vm593_vm0 = vmmov 0   ;;  %v594_v1 = vmov 0.0   ;;  %v663_v2 = vld [vmem:[%s775_s5] sm:$0xff] }
  0x12   :  { %517 = vmatprep.subr.bf16.mxu1 %v592_v0  ;;  %502 = vmatprep.subr.bf16.mxu0 %v592_v0  ;;  %v668_v3 = vld [vmem:[%s775_s5 + $0x8] sm:$0xff]  ;;  %v673_v4 = vld [vmem:[%s775_s5 + $0x10] sm:$0xff]  ;;  %v678_v5 = vld [vmem:[%s775_s5 + $0x18] sm:$0xff]  ;;  %vm143_vm1 = vcmask 130048   ;;  %vm53_vm2 = vcmask 261120   ;;  %vm265_vm3 = vcmask 785408  }
  0x13   :  { %476 = vmatprep.mubr.msk.f32.mxu1 %vm593_vm0, %v594_v1  ;;  %463 = vmatprep.mubr.msk.f32.mxu0 %vm593_vm0, %v594_v1  ;;  %v683_v6 = vld [vmem:[%s777_s7] ss:$0 sm:$0xff]  ;;  %v135_v8 = vld [vmem:[%s774_s4 + $0x8] sm:$0xff]  ;;  %v44_v13 = vld [vmem:[%s771_s1 + $0x10] sm:$0xff] }
  0x14   :  { %v134_v7 = vld [vmem:[%s774_s4] sm:$0xff]  ;;  %v43_v10 = vld [vmem:[%s771_s1 + $0x8] sm:$0xff]  ;;  %v45_v14 = vld [vmem:[%s771_s1 + $0x18] sm:$0xff] }
  0x15   :  { %v42_v9 = vld [vmem:[%s771_s1] sm:$0xff]  ;;  %v509_v11 = vpack.c.bf16 %v135_v8, %v134_v7  ;;  %v129_v15 = vld [vmem:[%s773_s3 + $0x10] sm:$0xff]  ;;  %v506_v16 = vpack.c.bf16 %v45_v14, %v44_v13  ;;  %v130_v17 = vld [vmem:[%s773_s3 + $0x18] sm:$0xff] }
  0x16   :  { %v503_v12 = vpack.c.bf16 %v43_v10, %v42_v9  ;;  %v41_v18 = vld [vmem:[#allocation3] sm:$0xff]  ;;  %v131_v19 = vld [vmem:[%s773_s3 + $0x20] sm:$0xff]  ;;  %v132_v21 = vld [vmem:[%s773_s3 + $0x28] sm:$0xff] }
  0x17   :  { %518 = vmatpush3.bf16.msra.mxu1 %v509_v11  ;;  %v127_v20 = vld [vmem:[%s773_s3] sm:$0xff]  ;;  %v128_v22 = vld [vmem:[%s773_s3 + $0x8] sm:$0xff]  ;;  %v133_v23 = vld [vmem:[%s773_s3 + $0x30] sm:$0xff] }
  0x18   :  { %504 = vmatpush3.bf16.msra.mxu0 %v503_v12  ;;  %v424_v24 = vld [vmem:[%s776_s6] ss:$0 sm:$0xff] }
  0x19   :  { %505 = vmatprep.subr.bf16.mxu0 %v592_v0  ;;  %v422_v28 = vld [vmem:[%s772_s2] ss:$0 sm:$0xff]  ;;  %s751_s2 = smov 0  }
  0x1a   :  { %477 = vmatmul.mubr.msk.f32.vlgmr.msra.gmra.mrb[0].mxu1 %vm143_vm1, %v129_v15 }
  0x1b   :  { %479 = vmatprep.mubr.msk.f32.mxu1 %vm593_vm0, %v594_v1 }
  0x1c   :  { %507 = vmatpush3.bf16.msra.mxu0 %v506_v16 }
  0x1d   :  { %508 = vmatprep.subr.bf16.mxu0 %v592_v0 }
  0x1e   :  { %480 = vmatmul.mubr.msk.f32.gmra.mrb[2].mxu1 %vm143_vm1, %v130_v17 }
  0x1f   :  { %464 = vmatmul.mubr.msk.f32.vlgmr.msra.gmra.mrb[0].mxu0 %vm53_vm2, %v41_v18  ;;  %482 = vmatprep.mubr.msk.f32.mxu1 %vm593_vm0, %v594_v1 }
  0x20   :  { %510 = vmatpush3.bf16.msra.mxu0 %v509_v11  ;;  %470 = vmatprep.mubr.msk.f32.mxu0 %vm593_vm0, %v594_v1 }
  0x22   :  { %483 = vmatmul.mubr.msk.f32.gmra.mrb[4].mxu1 %vm143_vm1, %v131_v19 }
  0x23   :  { %471 = vmatmul.mubr.msk.f32.vlgmr.msra.gmra.mrb[2].mxu0 %vm143_vm1, %v127_v20  ;;  %485 = vmatprep.mubr.msk.f32.mxu1 %vm593_vm0, %v594_v1 }
  0x24   :  { %473 = vmatprep.mubr.msk.f32.mxu0 %vm593_vm0, %v594_v1 }
  0x26   :  { %486 = vmatmul.mubr.msk.f32.gmra.mrb[6].mxu1 %vm143_vm1, %v132_v21 }
  0x27   :  { %474 = vmatmul.mubr.msk.f32.gmra.mrb[4].mxu0 %vm143_vm1, %v128_v22  ;;  %488 = vmatprep.mubr.msk.f32.mxu1 %vm593_vm0, %v594_v1 }
  0x2a   :  { %489 = vmatmul.mubr.msk.f32.gmra.mrb[8].mxu1 %vm143_vm1, %v133_v23 }
  0xed   :  { %v241_v25 = vpop.f32.mrb[0].mxu1 }
  0xee   :  { %v242_v26 = vadd.f32 %v424_v24, %v241_v25  ;;  %v478_v27 = vpop.f32.mrb[1].mxu1 }
  0xf0   :  { %268 = vst.msk [vmem:[#allocation2 + $0x10] sm:$0xff] %vm265_vm3, %v242_v26 }
  0xf1   :  { %v246_v29 = vpop.f32.mrb[2].mxu1 }
  0xf2   :  { %v123_v30 = vpop.f32.mrb[0].mxu0  ;;  %v247_v31 = vadd.f32 %v424_v24, %v246_v29  ;;  %v481_v32 = vpop.f32.mrb[3].mxu1 }
  0xf3   :  { %v124_v33 = vadd.f32 %v422_v28, %v123_v30   ;;  %v465_v34 = vpop.f32.mrb[1].mxu0 }
  0xf4   :  { %269 = vst.msk [vmem:[#allocation2 + $0x18] sm:$0xff] %vm265_vm3, %v247_v31 }
  0xf5   :  { %v251_v35 = vpop.f32.mrb[4].mxu1  ;;  %v583_v50 = vmov %v124_v33  }
  0xf6   :  { %v231_v36 = vpop.f32.mrb[2].mxu0  ;;  %v252_v37 = vadd.f32 %v424_v24, %v251_v35  ;;  %v484_v38 = vpop.f32.mrb[5].mxu1 }
  0xf7   :  { %v232_v39 = vadd.f32 %v424_v24, %v231_v36  ;;  %v472_v40 = vpop.f32.mrb[3].mxu0 }
  0xf8   :  { %270 = vst.msk [vmem:[#allocation2 + $0x20] sm:$0xff] %vm265_vm3, %v252_v37 }
  0xf9   :  { %266 = vst.msk [vmem:[#allocation2] sm:$0xff] %vm265_vm3, %v232_v39  ;;  %v256_v41 = vpop.f32.mrb[6].mxu1 }
  0xfa   :  { %v236_v42 = vpop.f32.mrb[4].mxu0  ;;  %v257_v43 = vadd.f32 %v424_v24, %v256_v41  ;;  %v487_v44 = vpop.f32.mrb[7].mxu1 }
  0xfb   :  { %v237_v45 = vadd.f32 %v424_v24, %v236_v42  ;;  %v475_v46 = vpop.f32.mrb[5].mxu0 }
  0xfc   :  { %271 = vst.msk [vmem:[#allocation2 + $0x28] sm:$0xff] %vm265_vm3, %v257_v43 }
  0xfd   :  { %267 = vst.msk [vmem:[#allocation2 + $0x8] sm:$0xff] %vm265_vm3, %v237_v45  ;;  %v261_v47 = vpop.f32.mrb[8].mxu1 }
  0xfe   :  { %v262_v48 = vadd.f32 %v424_v24, %v261_v47  ;;  %v490_v49 = vpop.f32.mrb[9].mxu1 }
 0x100   :  { %272 = vst.msk [vmem:[#allocation2 + $0x30] sm:$0xff] %vm265_vm3, %v262_v48 }
 0x101 LB: > { %v512_v51 = vpack.c.bf16 %v668_v3, %v663_v2  ;;  %v595_v52 = vmov 0.0|0.0   ;;  %s596_s3 = smov 64   ;;  %v515_v53 = vpack.c.bf16 %v678_v5, %v673_v4  ;;  %vm597_vm4 = vmmov 0   ;;  %s599_s6 = smov 32   ;;  %s589_s2 = sphi %s751_s2, %s288_s2   ;;  %v585_v50 = vphi %v583_v50, %v401_v50  }
 0x102   : > { %511 = vmatprep.subr.bf16.mxu0 %v595_v52  ;;  %373 = vrot.lane.b32.xlu0 %v683_v6, %s596_s3  ;;  %v598_v54 = vmov 0.0   ;;  %s433_s29 = sshll.u32 %s589_s2, 3  ;;  %s600_s9 = smov 96  }
 0x103   : > { %513 = vmatpush3.bf16.msra.mxu0 %v512_v51  ;;  %499 = vmatprep.mubr.msk.f32.mxu0 %vm597_vm4, %v598_v54  ;;  %s291_s30 = scalar_lea.vmem [#allocation2], %s433_s29  ;;  %s403_s7 = scalar_lea.vmem %s778_s8, %s433_s29 }
 0x104   : > { %514 = vmatprep.subr.bf16.mxu0 %v595_v52  ;;  %s288_s2 = sadd.s32 1, %s589_s2  }
 0x105   : > { %p285_p8 = scmp.ge.s32.totalorder %s288_s2, 7  }
 0x107   : > { %516 = vmatpush3.bf16.msra.mxu0 %v515_v53  ;;  %v292_v59 = vld [vmem:[%s291_s30] sm:$0xff] }
 0x10a   : > { %500 = vmatmul.mubr.msk.f32.vlgmr.msra.gmra.mrb[0].mxu0 %vm53_vm2, %v585_v50 }
 0x174   : > { %v374_v55 = vpop.permute.xlu0 %373 }
 0x1dd   : > { %v362_v56 = vpop.f32.mrb[0].mxu0 }
 0x1de   : > { %v376_v57 = vadd.f32 %v374_v55, %v362_v56  ;;  %v501_v58 = vpop.f32.mrb[1].mxu0  ;;  %v366_v60 = vadd.f32 %v362_v56, %v292_v59 }
 0x1e0   : > { %378 = vrot.lane.b32.xlu0 %v376_v57, %s596_s3  ;;  %v435_v61 = vmul.f32 -1.442695, %v366_v60 }
 0x1e2   : > { %545 = vpow2.f32 %v435_v61 }
 0x1e4   : > { %394 = vrot.lane.b32.xlu0 %v585_v50, %s599_s6 }
 0x1ec   : > { %v546_v62 = vpop.eup %545 }
 0x1ed   : > { %v370_v63 = vadd.f32 1.0, %v546_v62 }
 0x1ef   : > { %547 = vrcp.f32 %v370_v63 }
 0x1f9   : > { %v548_v0 = vpop.eup %547 }
 0x1fa   : > { %v388_v12 = vsub.f32 1.0, %v548_v0 }
 0x252   : > { %v379_v1 = vpop.permute.xlu0 %378 }
 0x253   : > { %v381_v7 = vmul.f32 %v548_v0, %v379_v1 }
 0x255   : > { %383 = vrot.lane.b32.xlu1 %v381_v7, %s596_s3 }
 0x256   : > { %v395_v11 = vpop.permute.xlu0 %394 }
 0x257   : > { %v397_v14 = vmul.f32 %v548_v0, %v395_v11 }
 0x2c7   : > { %v384_v8 = vpop.permute.xlu1 %383 }
 0x2c8   : > { %v386_v9 = vadd.f32 %v384_v8, %v292_v59 }
 0x2ca   : > { %549 = vtanh.f32 %v386_v9 }
 0x2d4   : > { %v550_v10 = vpop.eup %549 }
 0x2d5   : > { %390 = vrot.lane.b32.xlu1 %v550_v10, %s600_s9 }
 0x347   : > { %v391_v13 = vpop.permute.xlu1 %390 }
 0x348   : > { %v393_v15 = vmul.f32 %v391_v13, %v388_v12 }
 0x34a   : > { %v398_v16 = vadd.f32 %v397_v14, %v393_v15 }
 0x34c   : > { %400 = vrot.lane.b32.xlu1 %v398_v16, %s600_s9 }
 0x3b9   :  { %287 = sbr.rel (!%p285_p8) target bundleno = 257 (0x101), region = 65 }
 0x3be   : > { %v401_v50 = vpop.permute.xlu1 %400  }
 0x3bf   : > { %404 = vst.msk [vmem:[%s403_s7] sm:$0xff] %vm53_vm2, %v401_v50 }
 0x3c0   :  { %409 = vsyncpa [#allocation4], 1 }

</bundles_post_ra>
